<compile_context>
chip_gen: v7x
topology: tpu7x:2x2x1
jax: 0.10.0
libtpu: 0.0.40
codegen_flags: <defaults>
</compile_context>

<pallas_src>
import math
from typing import NamedTuple

import jax
import jax.numpy as jnp
from jax.experimental import pallas as pl
from jax.experimental.pallas import tpu as pltpu


def _round_up(x, m):
    return ((x + m - 1) // m) * m


def _softplus(x):
    # Stable softplus written with plain exp/log for conservative Mosaic lowering.
    return jnp.maximum(x, 0.0) + jnp.log(1.0 + jnp.exp(-jnp.abs(x)))


def _forest_kernel(x_ref, w1_ref, b1_ref, m_ref, c_ref, out_ref):
    # Zero this (core, batch-block) accumulator on its first tree block.
    @pl.when(pl.program_id(2) == 0)
    def _():
        out_ref[...] = jnp.zeros_like(out_ref)

    x = x_ref[...]                           # (Bblk, Fp)
    w1 = w1_ref[0]                           # (Fp, NIp)    packed fcn1 weights, 10x folded
    b1 = b1_ref[0]                           # (1, NIp)     packed fcn1 bias, 10x folded
    m = m_ref[0].astype(jnp.float32)         # (2*NIp, NLp) stacked 0/1 masks (bf16 in HBM)
    cmat = c_ref[0]                          # (NLp, Cp)    leaf values, 1/n_trees folded

    # fcn1 for all trees of this block in one MXU matmul (10x already in w1/b1).
    z = jnp.dot(x, w1, preferred_element_type=jnp.float32) + b1

    # Stable log-probabilities (never -inf): log(1-sigmoid(a)) = -softplus(a),
    # log(sigmoid(a)) = -softplus(-a).  Concatenate along lanes so the routing
    # product over internal nodes is a single MXU matmul against the stacked
    # (pos over neg) block-diagonal mask, followed by one exp.
    logcat = jnp.concatenate([-_softplus(z), -_softplus(-z)], axis=1)  # (Bblk, 2*NIp)
    xc = jnp.exp(jnp.dot(logcat, m, preferred_element_type=jnp.float32))

    # fcn2 + sum over this block's trees in one matmul; accumulate across blocks.
    out_ref[0] = out_ref[0] + jnp.dot(xc, cmat, preferred_element_type=jnp.float32)


class PackedForest(NamedTuple):
    w1: jax.Array      # (n_blocks, Fp, NIp)     float32
    b1: jax.Array      # (n_blocks, 1, NIp)      float32
    mask: jax.Array    # (n_blocks, 2*NIp, NLp)  bfloat16 (0/1 exact)
    leaf: jax.Array    # (n_blocks, NLp, Cp)     float32 (pre-scaled by 1/n_trees)
    n_trees: int
    n_features: int
    class_num: int
    trees_per_block: int
    core_splits: int
    blocks_per_split: int
    fp: int
    nip: int
    nlp: int
    cdim: int


def _default_trees_per_block(n_trees, n_internal, n_leaves, n_features, class_num,
                             lane, stream_budget_bytes=16 << 20):
    """Smallest tt making tt*n_leaves lane-aligned, doubled while the
    double-buffered streamed blocks stay within a conservative VMEM budget
    (safe for v7x's 64 MiB VMEM; raise the budget on v6e/v5e if desired)."""
    unit = max(1, lane // math.gcd(lane, max(n_leaves, 1)))
    tt = min(unit, max(1, n_trees))

    def streamed_bytes(t):
        nip = _round_up(t * n_internal, lane)
        nlp = _round_up(t * n_leaves, lane)
        fp = _round_up(n_features, lane)
        cd = _round_up(class_num, lane)
        per = (2 * nip * nlp) * 2 + fp * nip * 4 + nlp * cd * 4 + nip * 4
        return 2 * per  # double-buffered

    while tt * 2 <= n_trees and streamed_bytes(tt * 2) <= stream_budget_bytes:
        tt *= 2
    return tt


def pack_forest_params(w1, b1, bt, cmat, *, trees_per_block=None, core_splits=1,
                       lane=128):
    """Pack forest parameters ONCE (they are static for a trained forest).

    w1: (T, NI, F); b1: (T, 1, NI); bt: (T, NI, NL) in {-1,0,1}; cmat: (T, NL, C).
    core_splits: 1 on v5e/v6e (single TensorCore); 2 on v7x (two TensorCores).
    lane: 128 everywhere; 256 can help MXU utilization on v6e/v7x when padding allows.
    """
    n_trees, n_internal, n_features = w1.shape
    n_leaves, class_num = cmat.shape[1], cmat.shape[2]
    f32 = jnp.float32

    if trees_per_block is None:
        trees_per_block = _default_trees_per_block(
            n_trees, n_internal, n_leaves, n_features, class_num, lane)
    tt = max(1, min(trees_per_block, n_trees))           # trees per grid step
    nsplit = max(1, min(core_splits, max(1, n_trees // tt)))
    n_trees_p = _round_up(n_trees, tt * nsplit)
    n_blocks = n_trees_p // tt
    nbps = n_blocks // nsplit                            # tree blocks per core split

    fp = _round_up(n_features, lane)
    nip = _round_up(tt * n_internal, lane)
    nlp = _round_up(tt * n_leaves, lane)
    cdim = _round_up(class_num, lane)

    pad_t = n_trees_p - n_trees
    # Fold the 10x logit scale into the fcn1 parameters.
    w1 = jnp.pad(w1.astype(f32) * f32(10.0), ((0, pad_t), (0, 0), (0, 0)))
    b1 = jnp.pad(b1.astype(f32) * f32(10.0), ((0, pad_t), (0, 0), (0, 0)))
    bt = jnp.pad(bt.astype(f32), ((0, pad_t), (0, 0), (0, 0)))
    cmat = jnp.pad(cmat.astype(f32), ((0, pad_t), (0, 0), (0, 0)))

    # fcn1 weights, pre-transposed and packed tree-major along lanes: (blocks, Fp, NIp).
    w1_t = jnp.transpose(w1, (0, 2, 1)).reshape(n_blocks, tt, n_features, n_internal)
    w1_t = jnp.transpose(w1_t, (0, 2, 1, 3)).reshape(
        n_blocks, n_features, tt * n_internal)
    w1p = jnp.pad(w1_t, ((0, 0), (0, fp - n_features), (0, nip - tt * n_internal)))

    # fcn1 bias: (blocks, 1, NIp).
    b1p = b1.reshape(n_blocks, tt * n_internal)
    b1p = jnp.pad(b1p, ((0, 0), (0, nip - tt * n_internal)))[:, None, :]

    # Block-diagonal routing masks (stacked pos over neg): (blocks, 2*NIp, NLp).
    # Thresholded compares so non-exact +-1 encodings still work; 0/1 values are
    # exact in bf16, halving the dominant HBM stream.
    eye = jnp.eye(tt, dtype=f32)
    pos = (bt > 0.5).astype(f32).reshape(n_blocks, tt, n_internal, n_leaves)
    neg = (bt < -0.5).astype(f32).reshape(n_blocks, tt, n_internal, n_leaves)
    mpos = jnp.einsum('btji,ts->btjsi', pos, eye).reshape(
        n_blocks, tt * n_internal, tt * n_leaves)
    mneg = jnp.einsum('btji,ts->btjsi', neg, eye).reshape(
        n_blocks, tt * n_internal, tt * n_leaves)
    pad2 = ((0, 0), (0, nip - tt * n_internal), (0, nlp - tt * n_leaves))
    mp = jnp.concatenate([jnp.pad(mpos, pad2), jnp.pad(mneg, pad2)], axis=1)
    mp = mp.astype(jnp.bfloat16)

    # fcn2 weights with 1/n_trees folded in: (blocks, NLp, Cp).
    cp = (cmat / f32(n_trees)).reshape(n_blocks, tt * n_leaves, class_num)
    cp = jnp.pad(cp, ((0, 0), (0, nlp - tt * n_leaves), (0, cdim - class_num)))

    return PackedForest(w1p, b1p, mp, cp, n_trees, n_features, class_num,
                        tt, nsplit, nbps, fp, nip, nlp, cdim)


def random_forest_net_pallas(x, packed: PackedForest, *, batch_block=None,
                             vmem_limit_bytes=48 * 1024 * 1024):
    """x: (batch, n_features). Returns (batch, class_num)."""
    batch = x.shape[0]
    fp, nip, nlp, cdim = packed.fp, packed.nip, packed.nlp, packed.cdim
    nsplit, nbps = packed.core_splits, packed.blocks_per_split

    if batch_block is None:
        batch_block = min(_round_up(batch, 8), 256)
    bblk = _round_up(batch_block, 8)
    n_bblk = (batch + bblk - 1) // bblk
    bp_total = n_bblk * bblk

    xp = jnp.pad(x.astype(jnp.float32),
                 ((0, bp_total - batch), (0, fp - x.shape[1])))

    def wmap(c, b, k):
        return (c * nbps + k, 0, 0)

    out = pl.pallas_call(
        _forest_kernel,
        out_shape=jax.ShapeDtypeStruct((nsplit, bp_total, cdim), jnp.float32),
        grid_spec=pltpu.PrefetchScalarGridSpec(
            num_scalar_prefetch=0,
            grid=(nsplit, n_bblk, nbps),
            in_specs=[
                pl.BlockSpec((bblk, fp), lambda c, b, k: (b, 0)),
                pl.BlockSpec((1, fp, nip), wmap),
                pl.BlockSpec((1, 1, nip), wmap),
                pl.BlockSpec((1, 2 * nip, nlp), wmap),
                pl.BlockSpec((1, nlp, cdim), wmap),
            ],
            out_specs=pl.BlockSpec((1, bblk, cdim), lambda c, b, k: (c, b, 0)),
        ),
        compiler_params=pltpu.CompilerParams(
            dimension_semantics=("parallel", "parallel", "arbitrary"),
            vmem_limit_bytes=vmem_limit_bytes),
    )(xp, packed.w1, packed.b1, packed.mask, packed.leaf)

    # Combine per-core partial sums (no-op when core_splits == 1) and strip padding.
    res = out[0] if nsplit == 1 else jnp.sum(out, axis=0)
    return res[:batch, :packed.class_num]


def random_forest_net_forward(x, w1, b1, bt, cmat, **kwargs):
    """Convenience wrapper: pack + run. For inference, call pack_forest_params
    once and reuse the PackedForest across forward calls."""
    pack_kw = {k: kwargs.pop(k) for k in ("trees_per_block", "core_splits", "lane")
               if k in kwargs}
    packed = pack_forest_params(w1, b1, bt, cmat, **pack_kw)
    return random_forest_net_pallas(x, packed, **kwargs)


def random_forest_net_ref(x, w1, b1, bt, cmat):
    """Pure-JAX reference mirroring the PyTorch forward (loop over trees)."""
    n_trees = w1.shape[0]
    out = jnp.zeros((x.shape[0], cmat.shape[2]), jnp.float32)
    for t in range(n_trees):
        h = jax.nn.sigmoid((x @ w1[t].T + b1[t]) * 10.0)         # (batch, NI)
        terms = jnp.where(bt[t][None] > 0.5, 1.0 - h[:, :, None],
                          jnp.where(bt[t][None] < -0.5, h[:, :, None], 1.0))
        x_c = jnp.prod(terms, axis=1)                            # (batch, NL)
        out = out + (x_c @ cmat[t]) / n_trees
    return out


def make_params(key, n_trees, n_features, n_leaves, class_num):
    """Deterministic synthetic parameters matching the shapes Tree_net builds."""
    n_internal = n_leaves - 1
    k1, k2, k3, k4 = jax.random.split(key, 4)
    # change_parameters1: one-hot weight rows (split feature), bias = -threshold.
    feat_idx = jax.random.randint(k1, (n_trees, n_internal), 0, n_features)
    w1 = jax.nn.one_hot(feat_idx, n_features, dtype=jnp.float32)
    thr = jax.random.normal(k2, (n_trees, 1, n_internal), jnp.float32)
    b1 = -thr
    # Routing matrix entries in {-1, 0, +1} (transposed: (n_internal, n_leaves)).
    bt = jax.random.randint(k3, (n_trees, n_internal, n_leaves), -1, 2).astype(jnp.float32)
    # change_parameters2: fcn2 weight = c^T (so output = x_c @ c), bias = 0.
    cmat = jax.random.normal(k4, (n_trees, n_leaves, class_num), jnp.float32)
    return w1, b1, bt, cmat


if __name__ == "__main__":
    # Small shapes that exercise every grid axis:
    #   core_splits=2, trees_per_block=16 -> 48 trees padded to 64 -> 2 splits x 2 blocks,
    #   batch=20 with batch_block=8 -> 3 batch tiles.
    batch, n_features = 20, 16
    n_trees, n_leaves, class_num = 48, 8, 4

    key = jax.random.PRNGKey(0)
    kx, kp = jax.random.split(key)
    x = jax.random.normal(kx, (batch, n_features), jnp.float32)
    w1, b1, bt, cmat = make_params(kp, n_trees, n_features, n_leaves, class_num)

    # Pack once (parameters are static for a trained forest).
    packed = pack_forest_params(w1, b1, bt, cmat, trees_per_block=16, core_splits=2)
    out = random_forest_net_pallas(x, packed, batch_block=8)
    out = jax.block_until_ready(out)

    ref = random_forest_net_ref(x, w1, b1, bt, cmat)
    assert out.shape == (batch, class_num)
    assert jnp.allclose(out, ref, atol=1e-3, rtol=1e-3), (out, ref)

    print("KERNEL_OK")
</pallas_src>

<mosaic_0001>
module attributes {stable_mosaic.version = 11 : i64} {
  func.func @_forest_kernel(%arg0: i32, %arg1: i32, %arg2: i32, %arg3: memref<8x128xf32, #tpu.memory_space<vmem>>, %arg4: memref<1x128x128xf32, #tpu.memory_space<vmem>>, %arg5: memref<1x1x128xf32, #tpu.memory_space<vmem>>, %arg6: memref<1x256x128xbf16, #tpu.memory_space<vmem>>, %arg7: memref<1x128x128xf32, #tpu.memory_space<vmem>>, %arg8: memref<1x8x128xf32, #tpu.memory_space<vmem>>) attributes {dimension_semantics = [#tpu.dimension_semantics<parallel>, #tpu.dimension_semantics<parallel>, #tpu.dimension_semantics<arbitrary>], iteration_bounds = array<i64: 2, 3, 2>, scalar_prefetch = 0 : i64, scratch_operands = 0 : i64, tpu.core_type = #tpu.core_type<tc>, window_params = [{transform_indices = @transform_0, window_bounds = array<i64: 8, 128>}, {transform_indices = @transform_1, window_bounds = array<i64: 1, 128, 128>}, {transform_indices = @transform_2, window_bounds = array<i64: 1, 1, 128>}, {transform_indices = @transform_3, window_bounds = array<i64: 1, 256, 128>}, {transform_indices = @transform_4, window_bounds = array<i64: 1, 128, 128>}, {transform_indices = @transform_5, window_bounds = array<i64: 1, 8, 128>}]} {
    %c0_i32 = arith.constant 0 : i32
    %0 = arith.cmpi eq, %arg2, %c0_i32 : i32
    %1 = arith.extui %0 : i1 to i32
    %c0_i32_0 = arith.constant 0 : i32
    %2 = arith.cmpi ne, %1, %c0_i32_0 : i32
    scf.if %2 {
      %cst_31 = arith.constant 0.000000e+00 : f32
      %52 = vector.broadcast %cst_31 : f32 to vector<1x8x128xf32>
      %c0_32 = arith.constant 0 : index
      %c0_33 = arith.constant 0 : index
      %c0_34 = arith.constant 0 : index
      %53 = vector.load %arg8[%c0_32, %c0_33, %c0_34] : memref<1x8x128xf32, #tpu.memory_space<vmem>>, vector<1x8x128xf32>
      tpu.vector_store %arg8[%c0_32, %c0_33, %c0_34], %52 {strides = array<i32>} : memref<1x8x128xf32, #tpu.memory_space<vmem>>, vector<1x8x128xf32>,
    } else {
    }
    %c0 = arith.constant 0 : index
    %c0_1 = arith.constant 0 : index
    %3 = vector.load %arg3[%c0, %c0_1] : memref<8x128xf32, #tpu.memory_space<vmem>>, vector<8x128xf32>
    %c0_2 = arith.constant 0 : index
    %c0_3 = arith.constant 0 : index
    %c0_4 = arith.constant 0 : index
    %4 = vector.load %arg4[%c0_2, %c0_3, %c0_4] : memref<1x128x128xf32, #tpu.memory_space<vmem>>, vector<1x128x128xf32>
    %5 = vector.shape_cast %4 : vector<1x128x128xf32> to vector<128x128xf32>
    %c0_5 = arith.constant 0 : index
    %c0_6 = arith.constant 0 : index
    %c0_7 = arith.constant 0 : index
    %6 = vector.load %arg5[%c0_5, %c0_6, %c0_7] : memref<1x1x128xf32, #tpu.memory_space<vmem>>, vector<1x1x128xf32>
    %7 = vector.shape_cast %6 : vector<1x1x128xf32> to vector<1x128xf32>
    %c0_8 = arith.constant 0 : index
    %c0_9 = arith.constant 0 : index
    %c0_10 = arith.constant 0 : index
    %8 = vector.load %arg6[%c0_8, %c0_9, %c0_10] : memref<1x256x128xbf16, #tpu.memory_space<vmem>>, vector<1x256x128xbf16>
    %9 = vector.shape_cast %8 : vector<1x256x128xbf16> to vector<256x128xbf16>
    %10 = arith.extf %9 : vector<256x128xbf16> to vector<256x128xf32>
    %c0_11 = arith.constant 0 : index
    %c0_12 = arith.constant 0 : index
    %c0_13 = arith.constant 0 : index
    %11 = vector.load %arg7[%c0_11, %c0_12, %c0_13] : memref<1x128x128xf32, #tpu.memory_space<vmem>>, vector<1x128x128xf32>
    %12 = vector.shape_cast %11 : vector<1x128x128xf32> to vector<128x128xf32>
    %cst = arith.constant dense<0.000000e+00> : vector<8x128xf32>
    %13 = tpu.matmul %3, %5, %cst {dimension_numbers = #tpu.dot_dimension_numbers<[1], [0], [0], [1], [0, 0, 1, 1], [], []>} : vector<8x128xf32>, vector<128x128xf32>, vector<8x128xf32> -> vector<8x128xf32>
    %14 = vector.broadcast %7 : vector<1x128xf32> to vector<8x128xf32>
    %15 = arith.addf %13, %14 : vector<8x128xf32>
    %cst_14 = arith.constant 0.000000e+00 : f32
    %16 = vector.broadcast %cst_14 : f32 to vector<8x128xf32>
    %17 = arith.maximumf %15, %16 : vector<8x128xf32>
    %18 = math.absf %15 : vector<8x128xf32>
    %cst_15 = arith.constant 0.000000e+00 : f32
    %19 = vector.broadcast %cst_15 : f32 to vector<8x128xf32>
    %20 = arith.subf %19, %18 : vector<8x128xf32>
    %21 = math.exp %20 : vector<8x128xf32>
    %cst_16 = arith.constant 1.000000e+00 : f32
    %22 = vector.broadcast %cst_16 : f32 to vector<8x128xf32>
    %23 = arith.addf %22, %21 : vector<8x128xf32>
    %24 = math.log %23 : vector<8x128xf32>
    %25 = arith.addf %17, %24 : vector<8x128xf32>
    %cst_17 = arith.constant 0.000000e+00 : f32
    %26 = vector.broadcast %cst_17 : f32 to vector<8x128xf32>
    %27 = arith.subf %26, %25 : vector<8x128xf32>
    %cst_18 = arith.constant 0.000000e+00 : f32
    %28 = vector.broadcast %cst_18 : f32 to vector<8x128xf32>
    %29 = arith.subf %28, %15 : vector<8x128xf32>
    %cst_19 = arith.constant 0.000000e+00 : f32
    %30 = vector.broadcast %cst_19 : f32 to vector<8x128xf32>
    %31 = arith.maximumf %29, %30 : vector<8x128xf32>
    %32 = math.absf %29 : vector<8x128xf32>
    %cst_20 = arith.constant 0.000000e+00 : f32
    %33 = vector.broadcast %cst_20 : f32 to vector<8x128xf32>
    %34 = arith.subf %33, %32 : vector<8x128xf32>
    %35 = math.exp %34 : vector<8x128xf32>
    %cst_21 = arith.constant 1.000000e+00 : f32
    %36 = vector.broadcast %cst_21 : f32 to vector<8x128xf32>
    %37 = arith.addf %36, %35 : vector<8x128xf32>
    %38 = math.log %37 : vector<8x128xf32>
    %39 = arith.addf %31, %38 : vector<8x128xf32>
    %cst_22 = arith.constant 0.000000e+00 : f32
    %40 = vector.broadcast %cst_22 : f32 to vector<8x128xf32>
    %41 = arith.subf %40, %39 : vector<8x128xf32>
    %42 = tpu.concatenate %27, %41 in 1 : vector<8x128xf32>, vector<8x128xf32> -> vector<8x256xf32>
    %cst_23 = arith.constant dense<0.000000e+00> : vector<8x128xf32>
    %43 = tpu.matmul %42, %10, %cst_23 {dimension_numbers = #tpu.dot_dimension_numbers<[1], [0], [0], [1], [0, 0, 1, 1], [], []>} : vector<8x256xf32>, vector<256x128xf32>, vector<8x128xf32> -> vector<8x128xf32>
    %44 = math.exp %43 : vector<8x128xf32>
    %c0_24 = arith.constant 0 : index
    %c0_25 = arith.constant 0 : index
    %c0_26 = arith.constant 0 : index
    %45 = vector.load %arg8[%c0_24, %c0_25, %c0_26] : memref<1x8x128xf32, #tpu.memory_space<vmem>>, vector<1x8x128xf32>
    %46 = vector.shape_cast %45 : vector<1x8x128xf32> to vector<8x128xf32>
    %cst_27 = arith.constant dense<0.000000e+00> : vector<8x128xf32>
    %47 = tpu.matmul %44, %12, %cst_27 {dimension_numbers = #tpu.dot_dimension_numbers<[1], [0], [0], [1], [0, 0, 1, 1], [], []>} : vector<8x128xf32>, vector<128x128xf32>, vector<8x128xf32> -> vector<8x128xf32>
    %48 = arith.addf %46, %47 : vector<8x128xf32>
    %c0_28 = arith.constant 0 : index
    %c0_29 = arith.constant 0 : index
    %c0_30 = arith.constant 0 : index
    %49 = vector.load %arg8[%c0_28, %c0_29, %c0_30] : memref<1x8x128xf32, #tpu.memory_space<vmem>>, vector<1x8x128xf32>
    %50 = vector.shape_cast %49 : vector<1x8x128xf32> to vector<8x128xf32>
    %51 = vector.shape_cast %48 : vector<8x128xf32> to vector<1x8x128xf32>
    tpu.vector_store %arg8[%c0_28, %c0_29, %c0_30], %51 {strides = array<i32>} : memref<1x8x128xf32, #tpu.memory_space<vmem>>, vector<1x8x128xf32>,
    return
  }
  func.func @transform_0(%arg0: i32, %arg1: i32, %arg2: i32) -> (i32, i32) {
    %c0_i32 = arith.constant 0 : i32
    %c0_i32_0 = arith.constant 0 : i32
    return %arg1, %c0_i32 : i32, i32
  }
  func.func @transform_1(%arg0: i32, %arg1: i32, %arg2: i32) -> (i32, i32, i32) {
    %c2_i32 = arith.constant 2 : i32
    %0 = arith.muli %arg0, %c2_i32 : i32
    %1 = arith.addi %0, %arg2 : i32
    %c0_i32 = arith.constant 0 : i32
    %c0_i32_0 = arith.constant 0 : i32
    %c0_i32_1 = arith.constant 0 : i32
    return %1, %c0_i32, %c0_i32_0 : i32, i32, i32
  }
  func.func @transform_2(%arg0: i32, %arg1: i32, %arg2: i32) -> (i32, i32, i32) {
    %c2_i32 = arith.constant 2 : i32
    %0 = arith.muli %arg0, %c2_i32 : i32
    %1 = arith.addi %0, %arg2 : i32
    %c0_i32 = arith.constant 0 : i32
    %c0_i32_0 = arith.constant 0 : i32
    %c0_i32_1 = arith.constant 0 : i32
    return %1, %c0_i32, %c0_i32_0 : i32, i32, i32
  }
  func.func @transform_3(%arg0: i32, %arg1: i32, %arg2: i32) -> (i32, i32, i32) {
    %c2_i32 = arith.constant 2 : i32
    %0 = arith.muli %arg0, %c2_i32 : i32
    %1 = arith.addi %0, %arg2 : i32
    %c0_i32 = arith.constant 0 : i32
    %c0_i32_0 = arith.constant 0 : i32
    %c0_i32_1 = arith.constant 0 : i32
    return %1, %c0_i32, %c0_i32_0 : i32, i32, i32
  }
  func.func @transform_4(%arg0: i32, %arg1: i32, %arg2: i32) -> (i32, i32, i32) {
    %c2_i32 = arith.constant 2 : i32
    %0 = arith.muli %arg0, %c2_i32 : i32
    %1 = arith.addi %0, %arg2 : i32
    %c0_i32 = arith.constant 0 : i32
    %c0_i32_0 = arith.constant 0 : i32
    %c0_i32_1 = arith.constant 0 : i32
    return %1, %c0_i32, %c0_i32_0 : i32, i32, i32
  }
  func.func @transform_5(%arg0: i32, %arg1: i32, %arg2: i32) -> (i32, i32, i32) {
    %c0_i32 = arith.constant 0 : i32
    %c0_i32_0 = arith.constant 0 : i32
    return %arg0, %arg1, %c0_i32 : i32, i32, i32
  }
}

</mosaic_0001>

<bundles_post_ra>
// kernel: tpu_custom_call.1
= control target key start
LH: loop header
LB: loop body
LE: loop exit
PB: predicated region body
PF: predicated region fallthrough
CT: control target
= control target key end

     0   :  { %s2365_s0 = inlined_call_operand.hbm [shape: f32[24,128], index: 0, kind: input, shape index: {}]   ;;  %s2366_s1 = inlined_call_operand.hbm [shape: f32[4,128,128], index: 1, kind: input, shape index: {}]   ;;  %s2367_s2 = inlined_call_operand.vmem [shape: f32[4,1,128], index: 2, kind: input, shape index: {}]   ;;  %s2368_s3 = inlined_call_operand.hbm [shape: bf16[4,256,128], index: 3, kind: input, shape index: {}]   ;;  %s2369_s4 = inlined_call_operand.hbm [shape: f32[4,128,128], index: 4, kind: input, shape index: {}]   ;;  %s2370_s5 = inlined_call_operand.hbm [shape: f32[2,24,128], index: 5, kind: output, shape index: {}]  }
   0x1   :  { %2399 = sst [smem:[#allocation31_spill]] %s2366_s1 }
   0x2   :  { %2400 = sst [smem:[#allocation32_spill]] %s2367_s2 }
   0x3   :  { %2401 = sst [smem:[#allocation33_spill]] %s2368_s3 }
   0x4   :  { %2402 = sst [smem:[#allocation34_spill]] %s2369_s4 }
   0x5   :  { %2403 = sst [smem:[#allocation35_spill]] %s2370_s5 }
   0x6   :  { %10 = vsyncpa [#allocation3], 0 }
   0x7   :  { %12 = vsyncpa [#allocation3 + $0x1], 0 }
   0x8   :  { %13 = vsyncpa [#allocation6], 0 }
   0x9   :  { %15 = vsyncpa [#allocation6 + $0x1], 0 }
   0xa   :  { %16 = vsyncpa [#allocation9], 0 }
   0xb   :  { %18 = vsyncpa [#allocation9 + $0x1], 0 }
   0xc   :  { %19 = vsyncpa [#allocation4], 0 }
   0xd   :  { %21 = vsyncpa [#allocation4 + $0x1], 0  ;;  %s1812_s18 = smov 0   ;;  %s1814_s19 = smov 0  }
   0xe   :  { %s1816_s20 = smov 0   ;;  %s1818_s21 = smov 0  }
   0xf   :  { %s1820_s22 = smov 0   ;;  %s1822_s23 = smov 0  }
  0x10   :  { %s1824_s24 = smov 0   ;;  %s1826_s25 = smov 0  }
  0x11   :  { %s1828_s26 = smov 0   ;;  %s1830_s27 = smov 0  }
  0x12   :  { %s1832_s28 = smov 0   ;;  %s1834_s29 = smov 0  }
  0x13   :  { %s1836_s30 = smov 0   ;;  %s1838_s6 = smov 0  }
  0x14   :  { %s1840_s7 = smov 0   ;;  %s1842_s8 = smov 0  }
  0x15 LB: > { %2404 = sst [smem:[#allocation15_spill]] %s1723_s22  ;;  %s39_s9 = sadd.s32 1, %s1755_s30  ;;  %s1767_s8 = sphi %s1842_s8, %s27_s8   ;;  %s1763_s7 = sphi %s1840_s7, %s2470_s7   ;;  %s1759_s6 = sphi %s1838_s6, %s2469_s6   ;;  %s1755_s30 = sphi %s1836_s30, %s2468_s30   ;;  %s1751_s29 = sphi %s1834_s29, %s2477_s29   ;;  %s1747_s28 = sphi %s1832_s28, %s2466_s28   ;;  %s1743_s27 = sphi %s1830_s27, %s2465_s27   ;;  %s1739_s26 = sphi %s1828_s26, %s2464_s26   ;;  %s1735_s25 = sphi %s1826_s25, %s2476_s25   ;;  %s1731_s24 = sphi %s1824_s24, %s2462_s24   ;;  %s1727_s23 = sphi %s1822_s23, %s2475_s23   ;;  %s1723_s22 = sphi %s1820_s22, %s2474_s22   ;;  %s1719_s21 = sphi %s1818_s21, %s2460_s21   ;;  %s1715_s20 = sphi %s1816_s20, %s2473_s20   ;;  %s1711_s19 = sphi %s1814_s19, %s2472_s19   ;;  %s1707_s18 = sphi %s1812_s18, %s2471_s18  }
  0x16   : > { %2405 = sst [smem:[#allocation16_spill]] %s1735_s25  ;;  %p2378_p0 = scmp.eq.s32.totalorder %s1767_s8, 0 }
  0x17   : > { %2406 = sst [smem:[#allocation17_spill]] %s1739_s26  ;;  %p1894_p1 = scmp.ge.s32.totalorder %s39_s9, 2 }
  0x18   : > { %2407 = sst [smem:[#allocation18_spill]] %s1743_s27  ;;  %s963_s11 = sshll.u32 %s1763_s7, 1 }
  0x19   : > { %2408 = sst [smem:[#allocation19_spill]] %s1747_s28  ;;  %s1900_s12 = sadd.s32 %s1755_s30, %s963_s11 }
  0x1a   : > { %2409 = sst [smem:[#allocation20_spill]] %s1751_s29  ;;  %s2479_s9 = smov (%p1894_p1, %s39_s9), 0 }
  0x1b   : > { %2410 = sst [smem:[#allocation21_spill]] %s1755_s30  ;;  %p90_p2 = scmp.ne.s32.totalorder %s1727_s23, %s1723_s22 }
  0x1c   : > { %2411 = sst [smem:[#allocation22_spill]] %s1759_s6  ;;  %p2377_p3 = scmp.lt.s32.totalorder %s1767_s8, 12 }
  0x1d   : > { %2412 = sst [smem:[#allocation23_spill]] %s1763_s7  ;;  %s256_s14 = sand.u32 1, %s1767_s8  }
  0x1e   : > { %s2413_s10 = scalar_select %p1894_p1, 1, 0 }
  0x1f   : > { %2414 = sst [smem:[#allocation24_spill]] %s2479_s9  ;;  %p92_p4 = por %p90_p2, %p2378_p0 }
  0x20   : > { %s2373_s15 = sand.u32 1, %s1727_s23   ;;  %s1915_s16 = sshll.u32 %s1900_s12, 11 }
  0x21   : > { %s1919_s17 = sshll.u32 %s2373_s15, 7  ;;  %s2415_s1 = sld [smem:[#allocation31_spill]] }
  0x22   : > { %p1929_p5 = pnand %p2377_p3, %p92_p4  ;;  %s260_s28 = scalar_lea.vmem [#allocation5], %s1919_s17 }
  0x23   : > { %s269_s2 = sshll.u32 %s260_s28, 4  ;;  %s1937_s15 = scalar_lea.sflag [#allocation6], %s256_s14  ;;  %s1934_s2 = int_to_ptr.vmem [resolvable:$true] %s269_s2 }
  0x24   : > { %s2416_s30 = scalar_select %p1929_p5, 1, 0 }
  0x25   : > { %p1943_p8 = pneg %p1929_p5 }
  0x27   : > { %s1925_s13 = scalar_lea.hbm %s2415_s1, %s1915_s16  ;;  %s1482_s28 = scalar_lea.hbm %s2415_s1, 8192 }
  0x28   : > { %s1477_s5 = scalar_lea.hbm %s1925_s13, 2048  ;;  %p1483_p11 = scmp.lt.u32.totalorder %s1925_s13, %s2415_s1 }
  0x29   : > { %p1478_p7 = scmp.ne.s32.totalorder %s1925_s13, %s1477_s5  ;;  %p1484_p12 = scmp.lt.u32.totalorder %s1482_s28, %s1477_s5 }
  0x2a   : > { %p1486_p2 = scmp.lt.u32.totalorder %s1477_s5, %s1925_s13 }
  0x2b   : > { %p1480_p9 = pnand %p1943_p8, %p1478_p7  ;;  %p1485_p13 = por %p1484_p12, %p1483_p11 }
  0x2d   : > { %p1481_p10 = pneg %p1480_p9  ;;  %p1487_p4 = por %p1486_p2, %p1485_p13 }
  0x2f   : > { %p1488_p3 = pnand %p1487_p4, %p1481_p10 }
  0x31   : > { %1491 = shalt.err (!%p1488_p3)
}
  0x32   : > { %s1492_s14 = scalar_lea.vmem %s1934_s2, 2048  ;;  %s1769_s27 = smov [#allocation5]  }
  0x33   : > { %p1493_p7 = scmp.ne.s32.totalorder %s1934_s2, %s1492_s14  ;;  %s1497_s29 = sshll.u32 %s1769_s27, 4  ;;  %s1498_s29 = int_to_ptr.vmem [resolvable:$false] %s1497_s29 }
  0x34   : > { %s1499_s3 = scalar_lea.vmem %s1498_s29, 4096  ;;  %p1500_p6 = scmp.lt.s32.totalorder %s1934_s2, %s1498_s29 }
  0x35   : > { %p1495_p9 = pnand %p1493_p7, %p1943_p8  ;;  %p1501_p1 = scmp.lt.s32.totalorder %s1499_s3, %s1492_s14 }
  0x37   : > { %p1496_p0 = pneg %p1495_p9  ;;  %p1502_p11 = por %p1501_p1, %p1500_p6 }
  0x39   : > { %p1503_p12 = pnand %p1502_p11, %p1496_p0 }
  0x3b   : > { %1506 = shalt.err (!%p1503_p12)
}
  0x3c   : > { %s2380_s4 = smov 128   ;;  %s2381_s5 = smov 8  }
  0x3d   : > { %1318 = dma.hbm_to_vmem [thread:$0]  (!%p1929_p5), %s1925_s13, 2048, %s1934_s2, %s1937_s15, %s2380_s4, %s2380_s4, %s2381_s5  }
  0x3e   : > { %p333_p0 = scmp.lt.s32.totalorder %s1767_s8, 13  ;;  %p2418_p1 = scmp.ge.s32.totalorder %s1767_s8, 1 }
  0x3f   : > { %s1978_s14 = sadd.s32 4294967295, %s1767_s8   ;;  %s42_s29 = sadd.s32 1, %s1759_s6 }
  0x40   : > { %p1973_p3 = pnand %p2418_p1, %p333_p0  ;;  %s46_s3 = sadd.s32 1, %s1763_s7 }
  0x41   : > { %p2420_p6 = scmp.ne.s32.totalorder %s2413_s10, 0  ;;  %s53_s2 = sadd.s32 1, %s1739_s26 }
  0x42   : > { %s2419_s28 = scalar_select %p1973_p3, 1, 0 }
  0x43   : > { %s2481_s29 = smov (!%p2420_p6, %s42_s29), %s1759_s6  ;;  %p60_p10 = scmp.ne.s32.totalorder %s1739_s26, %s1735_s25 }
  0x44   : > { %p44_p13 = scmp.ge.s32.totalorder %s2481_s29, 3  ;;  %p66_p2 = scmp.ne.s32.totalorder %s1735_s25, %s1731_s24 }
  0x45   : > { %p2421_p4 = scmp.eq.s32.totalorder %s1767_s8, 0  ;;  %p67_p9 = scmp.eq.s32.totalorder %s1978_s14, 0 }
  0x46   : > { %s2483_s29 = smov (%p44_p13, %s2481_s29), 0  ;;  %s2485_s3 = smov (!%p44_p13, %s46_s3), %s1763_s7 }
  0x47   : > { %p1993_p7 = por %p2421_p4, %p60_p10  ;;  %2423 = sst [smem:[#allocation25_spill]] %s2483_s29 }
  0x48   : > { %s50_s10 = ssub.s32 %s1759_s6, %s2483_s29  ;;  %p2003_p11 = por %p67_p9, %p66_p2 }
  0x49   : > { %p48_p12 = scmp.ge.s32.totalorder %s2485_s3, 2  ;;  %p51_p0 = scmp.eq.s32.totalorder %s50_s10, 0 }
  0x4a   : > { %s2424_s4 = scalar_select %p2003_p11, 1, 0 }
  0x4b   : > { %p96_p1 = scmp.ne.s32.totalorder %s1723_s22, %s1719_s21  ;;  %s201_s24 = sadd.s32 1, %s1715_s20 }
  0x4c   : > { %2425 = sst [smem:[#allocation26_spill]] %s2424_s4  ;;  %s2487_s3 = smov (%p48_p12, %s2485_s3), 0 }
  0x4d   : > { %2426 = sst [smem:[#allocation27_spill]] %s2487_s3  ;;  %s964_s27 = sshll.u32 %s2487_s3, 1 }
  0x4e   : > { %s2013_s5 = scalar_select %p51_p0, %s1739_s26, %s53_s2  }
  0x4f   : > { %p2016_p6 = por %p96_p1, %p67_p9  ;;  %s79_s29 = sadd.s32 %s964_s27, %s2479_s9 }
  0x50   : > { %2427 = sst [smem:[#allocation28_spill]] %s2013_s5  ;;  %s196_s4 = ssub.s32 %s1763_s7, %s2487_s3 }
  0x51   : > { %s2428_s1 = scalar_select %p2016_p6, 1, 0 }
  0x52   : > { %s80_s21 = ssub.s32 %s1900_s12, %s79_s29  ;;  %s198_s22 = sor.u32 %s196_s4, %s50_s10 }
  0x53   : > { %2429 = sst [smem:[#allocation29_spill]] %s2428_s1  ;;  %p81_p10 = scmp.eq.s32.totalorder %s80_s21, 0 }
  0x54   : > { %p199_p13 = scmp.eq.s32.totalorder %s198_s22, 0  ;;  %p211_p2 = scmp.ne.s32.totalorder %s1715_s20, %s1711_s19 }
  0x55   : > { %p212_p4 = scmp.eq.s32.totalorder %s1978_s14, 11  ;;  %s2430_s2 = sadd.s32 1, %s1727_s23 }
  0x56   : > { %s2030_s5 = scalar_select %p81_p10, %s1727_s23, %s2430_s2  }
  0x57   : > { %s2033_s25 = scalar_select %p199_p13, %s1715_s20, %s201_s24  }
  0x58   : > { %2431 = sst [smem:[#allocation30_spill]] %s2030_s5  ;;  %p2035_p9 = por %p212_p4, %p211_p2 }
  0x59   : > { %p217_p12 = scmp.ne.s32.totalorder %s1711_s19, %s1707_s18  ;;  %s2433_s12 = sadd.s32 4294967294, %s1767_s8  }
  0x5a   : > { %s2432_s1 = scalar_select %p2035_p9, 1, 0 }
  0x5b   : > { %p218_p0 = scmp.eq.s32.totalorder %s2433_s12, 11  ;;  %s238_s4 = sand.u32 1, %s1739_s26  }
  0x5c   : > { %s973_s22 = sshll.u32 %s238_s4, 3  ;;  %s974_s29 = sshll.u32 %s1759_s6, 7 }
  0x5d   : > { %p2044_p1 = por %p218_p0, %p217_p12  ;;  %s242_s10 = scalar_lea.vmem [#allocation2], %s973_s22 }
  0x5e   : > { %s249_s21 = sshll.u32 %s242_s10, 4  ;;  %s2052_s24 = scalar_lea.hbm %s2365_s0, %s974_s29  ;;  %s2054_s21 = int_to_ptr.vmem [resolvable:$true] %s249_s21 }
  0x5f   : > { %s2434_s27 = scalar_select %p2044_p1, 1, 0 }
  0x60   : > { %p2435_p10 = scmp.lt.s32.totalorder %s1767_s8, 12  ;;  %s2437_s10 = sld [smem:[#allocation33_spill]] }
  0x61   : > { %s293_s29 = scalar_lea.vmem [#allocation7], %s1919_s17  ;;  %s239_s7 = scalar_lea.sflag [#allocation3], %s238_s4 }
  0x62   : > { %p2060_p13 = pnand %p2435_p10, %p1993_p7  ;;  %s302_s2 = sshll.u32 %s293_s29, 4  ;;  %s2071_s2 = int_to_ptr.vmem [resolvable:$true] %s302_s2 }
  0x63   : > { %s1507_s6 = scalar_lea.hbm %s2052_s24, 128  ;;  %s1512_s9 = scalar_lea.hbm %s2365_s0, 384 }
  0x64   : > { %p1508_p2 = scmp.ne.s32.totalorder %s2052_s24, %s1507_s6  ;;  %p1509_p4 = pneg %p2060_p13 }
  0x65   : > { %p1513_p0 = scmp.lt.u32.totalorder %s2052_s24, %s2365_s0  ;;  %p1514_p10 = scmp.lt.u32.totalorder %s1512_s9, %s1507_s6 }
  0x66   : > { %s2068_s3 = scalar_lea.hbm %s2437_s10, %s1915_s16  ;;  %p1510_p7 = pnand %p1509_p4, %p1508_p2 }
  0x67   : > { %p1515_p1 = por %p1514_p10, %p1513_p0  ;;  %p1516_p9 = scmp.lt.u32.totalorder %s1507_s6, %s2052_s24 }
  0x68   : > { %p1511_p12 = pneg %p1510_p7 }
  0x69   : > { %p1517_p6 = por %p1516_p9, %p1515_p1 }
  0x6b   : > { %p1518_p11 = pnand %p1517_p6, %p1511_p12 }
  0x6d   : > { %1521 = shalt.err (!%p1518_p11)
}
  0x6e   : > { %s1522_s4 = scalar_lea.vmem %s2054_s21, 128  ;;  %s1772_s26 = smov [#allocation2]  }
  0x6f   : > { %p1523_p2 = scmp.ne.s32.totalorder %s2054_s21, %s1522_s4  ;;  %s1527_s29 = sshll.u32 %s1772_s26, 4  ;;  %s1528_s29 = int_to_ptr.vmem [resolvable:$false] %s1527_s29 }
  0x70   : > { %s1529_s5 = scalar_lea.vmem %s1528_s29, 256  ;;  %p1530_p5 = scmp.lt.s32.totalorder %s2054_s21, %s1528_s29 }
  0x71   : > { %p1525_p7 = pnand %p1523_p2, %p1509_p4  ;;  %p1531_p0 = scmp.lt.s32.totalorder %s1529_s5, %s1522_s4 }
  0x73   : > { %p1526_p3 = pneg %p1525_p7  ;;  %p1532_p10 = por %p1531_p0, %p1530_p5 }
  0x75   : > { %p1533_p9 = pnand %p1532_p10, %p1526_p3 }
  0x77   : > { %1536 = shalt.err (!%p1533_p9)
}
  0x78   : > { %1315 = dma.hbm_to_vmem [thread:$0]  (!%p2060_p13), %s2052_s24, 128, %s2054_s21, %s239_s7  }
  0x79   : > { %s1537_s6 = scalar_lea.hbm %s2068_s3, 2048  ;;  %s1542_s22 = scalar_lea.hbm %s2437_s10, 8192 }
  0x7a   : > { %p1538_p11 = scmp.ne.s32.totalorder %s2068_s3, %s1537_s6  ;;  %p1543_p5 = scmp.lt.u32.totalorder %s2068_s3, %s2437_s10 }
  0x7b   : > { %p1544_p3 = scmp.lt.u32.totalorder %s1542_s22, %s1537_s6  ;;  %p1546_p12 = scmp.lt.u32.totalorder %s1537_s6, %s2068_s3 }
  0x7c   : > { %p1540_p6 = pnand %p1538_p11, %p1943_p8 }
  0x7d   : > { %p1545_p4 = por %p1544_p3, %p1543_p5 }
  0x7e   : > { %p1541_p1 = pneg %p1540_p6 }
  0x7f   : > { %p1547_p2 = por %p1546_p12, %p1545_p4 }
  0x81   : > { %p1548_p7 = pnand %p1547_p2, %p1541_p1 }
  0x83   : > { %1551 = shalt.err (!%p1548_p7)
}
  0x84   : > { %s1552_s7 = scalar_lea.vmem %s2071_s2, 2048  ;;  %s1773_s21 = smov [#allocation7]  }
  0x85   : > { %p1553_p13 = scmp.ne.s32.totalorder %s2071_s2, %s1552_s7  ;;  %s1557_s24 = sshll.u32 %s1773_s21, 4  ;;  %s1558_s24 = int_to_ptr.vmem [resolvable:$false] %s1557_s24 }
  0x86   : > { %s1559_s12 = scalar_lea.vmem %s1558_s24, 4096  ;;  %p1560_p9 = scmp.lt.s32.totalorder %s2071_s2, %s1558_s24 }
  0x87   : > { %p1555_p0 = pnand %p1553_p13, %p1943_p8  ;;  %p1561_p11 = scmp.lt.s32.totalorder %s1559_s12, %s1552_s7 }
  0x89   : > { %p1556_p10 = pneg %p1555_p0  ;;  %p1562_p6 = por %p1561_p11, %p1560_p9 }
  0x8b   : > { %p1563_p5 = pnand %p1562_p6, %p1556_p10 }
  0x8d   : > { %1566 = shalt.err (!%p1563_p5)
}
  0x8e   : > { %s1774_s29 = smov 64   ;;  %s1775_s5 = smov 4  }
  0x8f   : > { %p2438_p1 = scmp.ne.s32.totalorder %s2416_s30, 0  ;;  %s2439_s9 = sld [smem:[#allocation34_spill]] }
  0x90   : > { %s316_s4 = scalar_lea.vmem [#allocation8], %s1919_s17  ;;  %s2440_s7 = sand.u32 1, %s1727_s23  }
  0x91   : > { %1321 = dma.hbm_to_vmem [thread:$0]  (!%p2438_p1), %s2068_s3, 2048, %s2071_s2, %s1937_s15, %s1774_s29, %s1774_s29, %s1775_s5  }
  0x92   : > { %s325_s26 = sshll.u32 %s316_s4, 4  ;;  %s2131_s21 = scalar_lea.sflag [#allocation9], %s2440_s7  ;;  %s2127_s26 = int_to_ptr.vmem [resolvable:$true] %s325_s26 }
  0x95   : > { %s2124_s22 = scalar_lea.hbm %s2439_s9, %s1915_s16  ;;  %s1572_s16 = scalar_lea.hbm %s2439_s9, 8192 }
  0x96   : > { %s1567_s24 = scalar_lea.hbm %s2124_s22, 2048  ;;  %p1573_p2 = scmp.lt.u32.totalorder %s2124_s22, %s2439_s9 }
  0x97   : > { %p1568_p3 = scmp.ne.s32.totalorder %s2124_s22, %s1567_s24  ;;  %p1574_p7 = scmp.lt.u32.totalorder %s1572_s16, %s1567_s24 }
  0x98   : > { %p1576_p0 = scmp.lt.u32.totalorder %s1567_s24, %s2124_s22 }
  0x99   : > { %p1570_p4 = pnand %p1568_p3, %p1943_p8  ;;  %p1575_p13 = por %p1574_p7, %p1573_p2 }
  0x9b   : > { %p1571_p12 = pneg %p1570_p4  ;;  %p1577_p10 = por %p1576_p0, %p1575_p13 }
  0x9d   : > { %p1578_p9 = pnand %p1577_p10, %p1571_p12 }
  0x9f   : > { %1581 = shalt.err (!%p1578_p9)
}
  0xa0   : > { %s1582_s17 = scalar_lea.vmem %s2127_s26, 2048  ;;  %s1776_s29 = smov [#allocation8]  }
  0xa1   : > { %p1583_p11 = scmp.ne.s32.totalorder %s2127_s26, %s1582_s17  ;;  %s1587_s5 = sshll.u32 %s1776_s29, 4  ;;  %s1588_s5 = int_to_ptr.vmem [resolvable:$false] %s1587_s5 }
  0xa2   : > { %s1589_s6 = scalar_lea.vmem %s1588_s5, 4096  ;;  %p1590_p3 = scmp.lt.s32.totalorder %s2127_s26, %s1588_s5 }
  0xa3   : > { %p1585_p6 = pnand %p1583_p11, %p1943_p8  ;;  %p1591_p4 = scmp.lt.s32.totalorder %s1589_s6, %s1582_s17 }
  0xa5   : > { %p1586_p5 = pneg %p1585_p6  ;;  %p1592_p2 = por %p1591_p4, %p1590_p3 }
  0xa7   : > { %p1593_p7 = pnand %p1592_p2, %p1586_p5 }
  0xa9   : > { %1596 = shalt.err (!%p1593_p7)
}
  0xaa   : > { %s2441_s13 = smov 8   ;;  %s2442_s4 = smov 128  }
  0xab   : > { %1324 = dma.hbm_to_vmem [thread:$0]  (!%p2438_p1), %s2124_s22, 2048, %s2127_s26, %s2131_s21, %s2442_s4, %s2442_s4, %s2441_s13  }
  0xac   : > { %p2443_p8 = scmp.ne.s32.totalorder %s2419_s28, 0 }
  0xad   : > { %s2444_s11 = sld [smem:[#allocation16_spill]] (!%p2443_p8)  ;;  %s2445_s7 = sld [smem:[#allocation26_spill]] (!%p2443_p8) }
  0xae   : > { %337 = sbr.rel (%p2443_p8) target bundleno = 954 (0x3ba), region = 40 }
  0xb3   : > { %s339_s24 = sand.u32 (!%p2443_p8), 1, %s2444_s11   ;;  %p2446_p12 = scmp.ne.s32.totalorder (!%p2443_p8), %s2445_s7, 0 }
  0xb4   : > { %s2161_s15 = sshll.u32 (!%p2443_p8), %s339_s24, 3  ;;  %s340_s3 = scalar_lea.sflag (!%p2443_p8), [#allocation3], %s339_s24 }
  0xb5   : > { %s343_s16 = scalar_lea.vmem [#allocation2], %s2161_s15 }
  0xb6   : > { %1690 = dma.done.wait (%p2446_p12), %s340_s3, 128  }
  0xb7   : > { %1692 = vsyncadd (%p2446_p12), %s340_s3, 4294967168  ;;  %s2447_s30 = sld [smem:[#allocation15_spill]]  ;;  %s2448_s2 = sld [smem:[#allocation29_spill]] }
  0xb8   : > { %s348_s22 = sand.u32 1, %s1978_s14  }
  0xb9   : > { %s349_s21 = scalar_lea.sflag [#allocation6], %s348_s22 }
  0xbd   : > { %s350_s26 = sand.u32 1, %s2447_s30   ;;  %p2449_p1 = scmp.ne.s32.totalorder %s2448_s2, 0 }
  0xbe   : > { %s989_s28 = sshll.u32 %s350_s26, 7 }
  0xbf   : > { %s2170_s12 = scalar_lea.vmem [#allocation5], %s989_s28 }
  0xc0   : > { %1694 = dma.done.wait (%p2449_p1), %s349_s21, 4096  }
  0xc1   : > { %1696 = vsyncadd (%p2449_p1), %s349_s21, 4294963200  ;;  %s2176_s17 = scalar_lea.vmem [#allocation7], %s989_s28  ;;  %s367_s29 = scalar_lea.sflag [#allocation9], %s350_s26 }
  0xc2   : > { %s2178_s5 = scalar_lea.vmem [#allocation8], %s989_s28 }
  0xc3   : > { %1698 = dma.done.wait (%p2449_p1), %s367_s29, 2048  }
  0xc4   : > { %1700 = vsyncadd (%p2449_p1), %s367_s29, 4294965248  ;;  %s2450_s14 = sld [smem:[#allocation20_spill]]  ;;  %s2451_s6 = sld [smem:[#allocation18_spill]] }
  0xc5   : > { %s414_s13 = sand.u32 1, %s1711_s19   ;;  %s2452_s30 = sld [smem:[#allocation32_spill]] }
  0xc6   : > { %s992_s11 = sshll.u32 %s414_s13, 3 }
  0xc7   : > { %s2195_s26 = scalar_lea.vmem [#allocation10], %s992_s11 }
  0xca   : > { %s993_s4 = sshll.u32 %s2450_s14, 1  ;;  %p994_p0 = scmp.ne.s32.totalorder %s2451_s6, 0 }
  0xcb   : > { %s420_s7 = sadd.s32 %s2451_s6, %s993_s4  ;;  %v1777_v0 = vmov (!%p994_p0), 0.0  }
  0xcc   : > { %p421_p13 = scmp.lt.s32.totalorder %s420_s7, 3  ;;  %433 = sbr.rel (%p994_p0) target bundleno = 211 (0xd3), region = 60  ;;  %434 = vst [vmem:[%s2195_s26] sm:$0xff] (!%p994_p0), %v1777_v0 }
  0xce   : > { %s2489_s7 = smov (!%p421_p13, %s420_s7), 3 }
  0xcf   : > { %s423_s22 = scalar_lea.vmem %s2452_s30, %s2489_s7 }
  0xd3 PF: > { %v436_v1 = vld [vmem:[%s2170_s12] sm:$0xff]  ;;  %v437_v2 = vld [vmem:[%s2170_s12 + $0x8] sm:$0xff]  ;;  %v438_v3 = vld [vmem:[%s2170_s12 + $0x10] sm:$0xff]  ;;  %v1778_v4 = vmov 0.0|0.0   ;;  %vm1779_vm0 = vmmov 0   ;;  %v1780_v7 = vmov 0.0  }
  0xd4   : > { %1221 = vmatprep.subr.bf16.mxu0 %v1778_v4  ;;  %v1222_v5 = vpack.c.bf16 %v437_v2, %v436_v1  ;;  %v439_v6 = vld [vmem:[%s2170_s12 + $0x18] sm:$0xff]  ;;  %1183 = vmatprep.mubr.msk.f32.mxu0 %vm1779_vm0, %v1780_v7  ;;  %v440_v9 = vld [vmem:[%s2170_s12 + $0x20] sm:$0xff]  ;;  %v441_v10 = vld [vmem:[%s2170_s12 + $0x28] sm:$0xff]  ;;  %s2454_s28 = sld [smem:[#allocation20_spill]]  ;;  %s2455_s21 = sld [smem:[#allocation19_spill]] }
  0xd5   : > { %v1225_v8 = vpack.c.bf16 %v439_v6, %v438_v3  ;;  %v1228_v11 = vpack.c.bf16 %v441_v10, %v440_v9  ;;  %v442_v12 = vld [vmem:[%s2170_s12 + $0x30] sm:$0xff]  ;;  %v443_v13 = vld [vmem:[%s2170_s12 + $0x38] sm:$0xff]  ;;  %v444_v15 = vld [vmem:[%s2170_s12 + $0x40] sm:$0xff]  ;;  %s2456_s4 = sld [smem:[#allocation35_spill]]  ;;  %s776_s7 = scalar_lea.sflag [#allocation4], %s414_s13 }
  0xd6   : > { %1223 = vmatpush3.bf16.msra.mxu0 %v1222_v5  ;;  %v1231_v14 = vpack.c.bf16 %v443_v13, %v442_v12  ;;  %v445_v16 = vld [vmem:[%s2170_s12 + $0x48] sm:$0xff]  ;;  %v446_v18 = vld [vmem:[%s2170_s12 + $0x50] sm:$0xff]  ;;  %v447_v19 = vld [vmem:[%s2170_s12 + $0x58] sm:$0xff]  ;;  %p2457_p9 = scmp.ne.s32.totalorder %s2432_s1, 0  ;;  %s1781_s3 = smov [#allocation10]  }
  0xd7   : > { %1224 = vmatprep.subr.bf16.mxu0 %v1778_v4  ;;  %v1234_v17 = vpack.c.bf16 %v445_v16, %v444_v15  ;;  %v1237_v20 = vpack.c.bf16 %v447_v19, %v446_v18  ;;  %v448_v21 = vld [vmem:[%s2170_s12 + $0x60] sm:$0xff]  ;;  %v449_v22 = vld [vmem:[%s2170_s12 + $0x68] sm:$0xff]  ;;  %v450_v24 = vld [vmem:[%s2170_s12 + $0x70] sm:$0xff]  ;;  %s1601_s30 = sshll.u32 %s1781_s3, 4  ;;  %s1602_s30 = int_to_ptr.vmem [resolvable:$false] %s1601_s30 }
  0xd8   : > { %v1240_v23 = vpack.c.bf16 %v449_v22, %v448_v21  ;;  %v451_v25 = vld [vmem:[%s2170_s12 + $0x78] sm:$0xff]  ;;  %v1074_v28 = vld [vmem:[%s2176_s17 + $0x40] sm:$0xff]   ;;  %v1075_v30 = vld [vmem:[%s2176_s17 + $0x48] sm:$0xff]  }
  0xd9   : > { %v1243_v26 = vpack.c.bf16 %v451_v25, %v450_v24  ;;  %v435_v27 = vld [vmem:[%s343_s16] sm:$0xff]  ;;  %1246 = vmatprep.subr.bf16.mxu1 %v1074_v28  ;;  %v1004_v29 = vld [vmem:[%s2176_s17] sm:$0xff]   ;;  %v1067_v31 = vld [vmem:[%s2176_s17 + $0x8] sm:$0xff]  }
  0xda   : > { %1226 = vmatpush3.bf16.msra.mxu0 %v1225_v8  ;;  %1248 = vmatpush3.bf16.msra.mxu1 %v1004_v29  ;;  %v1076_v32 = vld [vmem:[%s2176_s17 + $0x50] sm:$0xff]   ;;  %v1077_v34 = vld [vmem:[%s2176_s17 + $0x58] sm:$0xff]   ;;  %v1078_v36 = vld [vmem:[%s2176_s17 + $0x60] sm:$0xff]   ;;  %s1301_s12 = smul.u32 3, %s2454_s28 }
  0xdb   : > { %1227 = vmatprep.subr.bf16.mxu0 %v1778_v4  ;;  %1250 = vmatprep.subr.bf16.mxu1 %v1075_v30  ;;  %v1068_v33 = vld [vmem:[%s2176_s17 + $0x10] sm:$0xff]   ;;  %v1069_v35 = vld [vmem:[%s2176_s17 + $0x18] sm:$0xff]   ;;  %v1070_v37 = vld [vmem:[%s2176_s17 + $0x20] sm:$0xff]  }
  0xdc   : > { %v1079_v38 = vld [vmem:[%s2176_s17 + $0x68] sm:$0xff]   ;;  %v1080_v40 = vld [vmem:[%s2176_s17 + $0x70] sm:$0xff]   ;;  %v1081_v42 = vld [vmem:[%s2176_s17 + $0x78] sm:$0xff]  }
  0xdd   : > { %v1071_v39 = vld [vmem:[%s2176_s17 + $0x28] sm:$0xff]   ;;  %v1072_v41 = vld [vmem:[%s2176_s17 + $0x30] sm:$0xff]   ;;  %v1073_v43 = vld [vmem:[%s2176_s17 + $0x38] sm:$0xff]   ;;  %s787_s17 = sadd.s32 %s2455_s21, %s1301_s12 }
  0xde   : > { %1229 = vmatpush3.bf16.msra.mxu0 %v1228_v11  ;;  %1252 = vmatpush3.bf16.msra.mxu1 %v1067_v31  ;;  %v517_v44 = vld [vmem:[%s2178_s5] sm:$0xff]  ;;  %v518_v45 = vld [vmem:[%s2178_s5 + $0x8] sm:$0xff]  ;;  %v519_v46 = vld [vmem:[%s2178_s5 + $0x10] sm:$0xff]  ;;  %s997_s29 = sshll.u32 %s787_s17, 7 }
  0xdf   : > { %1230 = vmatprep.subr.bf16.mxu0 %v1778_v4  ;;  %1254 = vmatprep.subr.bf16.mxu1 %v1076_v32  ;;  %v1278_v47 = vpack.c.bf16 %v518_v45, %v517_v44  ;;  %v520_v48 = vld [vmem:[%s2178_s5 + $0x18] sm:$0xff]  ;;  %v521_v50 = vld [vmem:[%s2178_s5 + $0x20] sm:$0xff]  ;;  %v522_v51 = vld [vmem:[%s2178_s5 + $0x28] sm:$0xff]  ;;  %s2279_s11 = scalar_lea.hbm %s2456_s4, %s997_s29 }
  0xe0   : > { %v1281_v49 = vpack.c.bf16 %v520_v48, %v519_v46  ;;  %v1284_v52 = vpack.c.bf16 %v522_v51, %v521_v50  ;;  %v523_v53 = vld [vmem:[%s2178_s5 + $0x30] sm:$0xff]  ;;  %v524_v54 = vld [vmem:[%s2178_s5 + $0x38] sm:$0xff]  ;;  %v525_v18 = vld [vmem:[%s2178_s5 + $0x40] sm:$0xff] }
  0xe1   : > { %v1287_v55 = vpack.c.bf16 %v524_v54, %v523_v53  ;;  %v995_v56 = vld [vmem:[%s423_s22] ss:$0 sm:$0xff]  ;;  %v526_v19 = vld [vmem:[%s2178_s5 + $0x48] sm:$0xff]  ;;  %v528_v22 = vld [vmem:[%s2178_s5 + $0x58] sm:$0xff]  ;;  %s1603_s22 = scalar_lea.vmem %s1602_s30, 256 }
  0xe2   : > { %1232 = vmatpush3.bf16.msra.mxu0 %v1231_v14  ;;  %1256 = vmatpush3.bf16.msra.mxu1 %v1068_v33  ;;  %v527_v21 = vld [vmem:[%s2178_s5 + $0x50] sm:$0xff]  ;;  %v529_v24 = vld [vmem:[%s2178_s5 + $0x60] sm:$0xff]  ;;  %v530_v25 = vld [vmem:[%s2178_s5 + $0x68] sm:$0xff] }
  0xe3   : > { %1233 = vmatprep.subr.bf16.mxu0 %v1778_v4  ;;  %1258 = vmatprep.subr.bf16.mxu1 %v1077_v34  ;;  %v532_v28 = vld [vmem:[%s2178_s5 + $0x78] sm:$0xff] }
  0xe6   : > { %1235 = vmatpush3.bf16.msra.mxu0 %v1234_v17  ;;  %1260 = vmatpush3.bf16.msra.mxu1 %v1069_v35  ;;  %v702_v35 = vld [vmem:[%s2195_s26] sm:$0xff] }
  0xe7   : > { %1236 = vmatprep.subr.bf16.mxu0 %v1778_v4  ;;  %1262 = vmatprep.subr.bf16.mxu1 %v1078_v36 }
  0xea   : > { %1238 = vmatpush3.bf16.msra.mxu0 %v1237_v20  ;;  %1264 = vmatpush3.bf16.msra.mxu1 %v1070_v37  ;;  %v1290_v20 = vpack.c.bf16 %v526_v19, %v525_v18 }
  0xeb   : > { %1239 = vmatprep.subr.bf16.mxu0 %v1778_v4  ;;  %1266 = vmatprep.subr.bf16.mxu1 %v1079_v38 }
  0xee   : > { %1241 = vmatpush3.bf16.msra.mxu0 %v1240_v23  ;;  %1268 = vmatpush3.bf16.msra.mxu1 %v1071_v39  ;;  %v1293_v23 = vpack.c.bf16 %v528_v22, %v527_v21 }
  0xef   : > { %1242 = vmatprep.subr.bf16.mxu0 %v1778_v4  ;;  %1270 = vmatprep.subr.bf16.mxu1 %v1080_v40 }
  0xf2   : > { %1244 = vmatpush3.bf16.msra.mxu0 %v1243_v26  ;;  %1272 = vmatpush3.bf16.msra.mxu1 %v1072_v41  ;;  %v1296_v26 = vpack.c.bf16 %v530_v25, %v529_v24 }
  0xf3   : > { %1277 = vmatprep.subr.bf16.mxu0 %v1778_v4  ;;  %1274 = vmatprep.subr.bf16.mxu1 %v1081_v42 }
  0xf5   : > { %1184 = vmatmul.mubr.f32.vlgmr.msra.gmra.mrb[0].mxu0 %v435_v27  ;;  %v531_v27 = vld [vmem:[%s2178_s5 + $0x70] sm:$0xff]  ;;  %s791_s5 = sshll.u32 %s2195_s26, 4  ;;  %s2281_s5 = int_to_ptr.vmem [resolvable:$true] %s791_s5 }
  0xf6   : > { %1218 = vmatprep.mubr.msk.f32.mxu0 %vm1779_vm0, %v1780_v7  ;;  %1276 = vmatpush3.bf16.msra.mxu1 %v1073_v43  ;;  %v1299_v29 = vpack.c.bf16 %v532_v28, %v531_v27  ;;  %s1597_s24 = scalar_lea.vmem %s2281_s5, 128  ;;  %p1604_p5 = scmp.lt.s32.totalorder %s2281_s5, %s1602_s30 }
  0xf7   : > { %1279 = vmatpush3.bf16.msra.mxu0 %v1278_v47  ;;  %p1598_p10 = scmp.ne.s32.totalorder %s2281_s5, %s1597_s24  ;;  %p1605_p3 = scmp.lt.s32.totalorder %s1603_s22, %s1597_s24 }
  0xf8   : > { %1280 = vmatprep.subr.bf16.mxu0 %v1778_v4 }
  0xf9   : > { %p1599_p11 = pnand %p1598_p10, %p2457_p9  ;;  %p1606_p4 = por %p1605_p3, %p1604_p5 }
  0xfb   : > { %1282 = vmatpush3.bf16.msra.mxu0 %v1281_v49  ;;  %p1600_p6 = pneg %p1599_p11 }
  0xfc   : > { %1283 = vmatprep.subr.bf16.mxu0 %v1778_v4 }
  0xfd   : > { %p1607_p2 = pnand %p1606_p4, %p1600_p6 }
  0xff   : > { %1285 = vmatpush3.bf16.msra.mxu0 %v1284_v52 }
 0x100   : > { %1286 = vmatprep.subr.bf16.mxu0 %v1778_v4 }
 0x103   : > { %1288 = vmatpush3.bf16.msra.mxu0 %v1287_v55 }
 0x104   : > { %1289 = vmatprep.subr.bf16.mxu0 %v1778_v4 }
 0x107   : > { %1291 = vmatpush3.bf16.msra.mxu0 %v1290_v20 }
 0x108   : > { %1292 = vmatprep.subr.bf16.mxu0 %v1778_v4 }
 0x10b   : > { %1294 = vmatpush3.bf16.msra.mxu0 %v1293_v23 }
 0x10c   : > { %1295 = vmatprep.subr.bf16.mxu0 %v1778_v4 }
 0x10f   : > { %1297 = vmatpush3.bf16.msra.mxu0 %v1296_v26 }
 0x110   : > { %1298 = vmatprep.subr.bf16.mxu0 %v1778_v4 }
 0x113   : > { %1300 = vmatpush3.bf16.msra.mxu0 %v1299_v29 }
 0x1c8   : > { %v605_v57 = vpop.f32.mrb[0].mxu0 }
 0x1c9   : > { %v606_v58 = vadd.f32 %v995_v56, %v605_v57  ;;  %v1185_v59 = vpop.f32.mrb[1].mxu0 }
 0x1cb   : > { %v610_v60 = vand.u32 2147483647, %v606_v58  ;;  %v619_v61 = vsub.f32 0.0, %v606_v58  ;;  %v609_v11 = vmax.f32 %v606_v58, 0.0 }
 0x1cd   : > { %v611_v62 = vsub.f32 0.0, %v610_v60  ;;  %v621_v63 = vand.u32 2147483647, %v619_v61  ;;  %v620_v12 = vmax.f32 %v619_v61, 0.0 }
 0x1cf   : > { %v612_v0 = vmul.f32 1.442695, %v611_v62  ;;  %v622_v1 = vsub.f32 0.0, %v621_v63 }
 0x1d1   : > { %1467 = vpow2.f32 %v612_v0  ;;  %v623_v2 = vmul.f32 1.442695, %v622_v1 }
 0x1d3   : > { %1469 = vpow2.f32 %v623_v2 }
 0x1db   : > { %v1468_v3 = vpop.eup %1467 }
 0x1dc   : > { %v614_v5 = vadd.f32 1.0, %v1468_v3 }
 0x1dd   : > { %v1470_v6 = vpop.eup %1469 }
 0x1de   : > { %v625_v7 = vadd.f32 1.0, %v1470_v6  ;;  %1471 = vlog2.f32 %v614_v5 }
 0x1e0   : > { %1473 = vlog2.f32 %v625_v7 }
 0x1e8   : > { %v1472_v8 = vpop.eup %1471 }
 0x1e9   : > { %v616_v9 = vmul.f32 0.6931472, %v1472_v8 }
 0x1ea   : > { %v1474_v10 = vpop.eup %1473 }
 0x1eb   : > { %v627_v13 = vmul.f32 0.6931472, %v1474_v10  ;;  %v617_v14 = vadd.f32 %v616_v9, %v609_v11 }
 0x1ed   : > { %v628_v15 = vadd.f32 %v627_v13, %v620_v12  ;;  %v618_v17 = vsub.f32 0.0, %v617_v14 }
 0x1ef   : > { %v629_v16 = vsub.f32 0.0, %v628_v15 }
 0x1f1   : > { %694 = vmatprep.mubr.f32.mxu1 %v629_v16 }
 0x1f2   : > { %695 = vmatmul.mubr.f32.vlgmr.msra.gmra.mrb[0].mxu1 %v618_v17 }
 0x2c5   : > { %v1131_v30 = vpop.f32.mrb[0].mxu1 }
 0x2c6   : > { %v1132_v31 = vpop.f32.mrb[1].mxu1 }
 0x2c7   : > { %v1133_v32 = vadd.f32 %v1132_v31, %v1131_v30 }
 0x2c9   : > { %v700_v33 = vmul.f32 1.442695, %v1133_v32 }
 0x2cb   : > { %1475 = vpow2.f32 %v700_v33 }
 0x2d5   : > { %v1476_v34 = vpop.eup %1475 }
 0x2d6   : > { %1219 = vmatmul.mubr.f32.vlgmr.msra.gmra.mrb[2].mxu0 %v1476_v34 }
 0x3a9   : > { %v769_v36 = vpop.f32.mrb[2].mxu0 }
 0x3aa   : > { %v773_v37 = vadd.f32 %v769_v36, %v702_v35  ;;  %v1220_v38 = vpop.f32.mrb[3].mxu0 }
 0x3ac   : > { %774 = vst [vmem:[%s2195_s26] sm:$0xff] %v773_v37 }
 0x3ad   : > { %1610 = shalt.err (!%p1607_p2)
}
 0x3ae   : > { %s1611_s13 = scalar_lea.hbm %s2279_s11, 128  ;;  %s1615_s16 = scalar_lea.hbm %s2456_s4, 768 }
 0x3af   : > { %p1612_p7 = scmp.ne.s32.totalorder %s2279_s11, %s1611_s13  ;;  %p1616_p1 = scmp.lt.u32.totalorder %s2279_s11, %s2456_s4 }
 0x3b0   : > { %p1617_p13 = scmp.lt.u32.totalorder %s1615_s16, %s1611_s13  ;;  %p1619_p10 = scmp.lt.u32.totalorder %s1611_s13, %s2279_s11 }
 0x3b1   : > { %p1613_p8 = pnand %p1612_p7, %p2457_p9 }
 0x3b2   : > { %p1618_p0 = por %p1617_p13, %p1616_p1 }
 0x3b3   : > { %p1614_p12 = pneg %p1613_p8 }
 0x3b4   : > { %p1620_p11 = por %p1619_p10, %p1618_p0 }
 0x3b6   : > { %p1621_p6 = pnand %p1620_p11, %p1614_p12 }
 0x3b8   : > { %1624 = shalt.err (!%p1621_p6)
}
 0x3b9   : > { %1310 = dma.vmem_to_hbm [thread:$0]  (%p2457_p9), %s2281_s5, 128, %s2279_s11, %s776_s7  }
 0x3ba PF: > { %p1330_p5 = scmp.ge.s32.totalorder %s1767_s8, 2  ;;  %s803_s21 = sand.u32 1, %s1707_s18  }
 0x3bb   : > { %p2458_p3 = scmp.ne.s32.totalorder %s2434_s27, 0  ;;  %s804_s12 = scalar_lea.sflag [#allocation4], %s803_s21 }
 0x3bd   : > { %p1326_p4 = pnand %p1330_p5, %p2458_p3 }
 0x3bf   : > { %1702 = dma.done.wait (!%p1326_p4), %s804_s12, 128  }
 0x3c0   : > { %1704 = vsyncadd (!%p1326_p4), %s804_s12, 4294967168  ;;  %s27_s8 = sadd.s32 1, %s1767_s8   ;;  %s2460_s21 = sld [smem:[#allocation15_spill]] }
 0x3c1   : > { %p2312_p2 = scmp.ge.s32.totalorder %s27_s8, 14   ;;  %s2461_s1 = sld [smem:[#allocation30_spill]] }
 0x3c2   : > { %s2462_s24 = sld [smem:[#allocation16_spill]]  ;;  %s2463_s29 = sld [smem:[#allocation17_spill]] }
 0x3c3   : > { %s2464_s26 = sld [smem:[#allocation28_spill]]  ;;  %s2465_s27 = sld [smem:[#allocation21_spill]] }
 0x3c4   : > { %s2466_s28 = sld [smem:[#allocation22_spill]]  ;;  %s2467_s5 = sld [smem:[#allocation23_spill]] }
 0x3c5   : > { %s2468_s30 = sld [smem:[#allocation24_spill]]  ;;  %s2469_s6 = sld [smem:[#allocation25_spill]] }
 0x3c6   : > { %s2470_s7 = sld [smem:[#allocation27_spill]]  ;;  %s2471_s18 = smov %s1711_s19 }
 0x3c7   : > { %s2472_s19 = smov %s1715_s20  ;;  %s2473_s20 = smov %s2033_s25 }
 0x3c8   : > { %s2474_s22 = smov %s1727_s23  ;;  %s2475_s23 = smov %s2461_s1 }
 0x3c9   : > { %s2476_s25 = smov %s2463_s29  ;;  %26 = sbr.rel (!%p2312_p2) target bundleno = 21 (0x15), region = 129 }
 0x3ca   : > { %s2477_s29 = smov %s2467_s5 }
 0x3d0   :  { %809 = vsyncpa [#allocation3], 1 }
 0x3d1   :  { %811 = vsyncpa [#allocation3 + $0x1], 1 }
 0x3d2   :  { %812 = vsyncpa [#allocation6], 1 }
 0x3d3   :  { %814 = vsyncpa [#allocation6 + $0x1], 1 }
 0x3d4   :  { %815 = vsyncpa [#allocation9], 1 }
 0x3d5   :  { %817 = vsyncpa [#allocation9 + $0x1], 1 }
 0x3d6   :  { %818 = vsyncpa [#allocation4], 1 }
 0x3d7   :  { %820 = vsyncpa [#allocation4 + $0x1], 1 }

</bundles_post_ra>
